<compile_context>
chip_gen: v6e
topology: v6e:2x2x1
jax: 0.10.0
libtpu: 0.0.40
codegen_flags: <defaults>
</compile_context>

<pallas_src>
import functools

import jax
import jax.numpy as jnp
from jax.experimental import pallas as pl
from jax.experimental.pallas import tpu as pltpu


def _round_up(v, m):
    return (v + m - 1) // m * m


# ----------------------------------------------------------------------------
# Fused multi-layer GCN kernel body
# ----------------------------------------------------------------------------
def _gconv_stack_kernel(a_ref, x_ref, w_ref, b_ref, o_ref, z_cur, z_nxt, *, tm):
    l = pl.program_id(0)          # layer index (sequential)
    i = pl.program_id(1)          # node-row tile index
    num_i = pl.num_programs(1)

    # Seed the resident activation buffer with the (padded, bf16) input features.
    @pl.when((l == 0) & (i == 0))
    def _():
        z_cur[...] = x_ref[...]

    row0 = pl.multiple_of(i * tm, tm)
    a_tile = a_ref[pl.ds(row0, tm), :]                    # (tm, Np)  bf16

    # Aggregation: A[tile, :] @ Z  -- N^2 contraction on the MXU, f32 accumulate.
    agg = jnp.dot(a_tile, z_cur[...], preferred_element_type=jnp.float32)
    # Feature transform + bias + ReLU (bias/activation kept in f32).
    h = jnp.dot(agg.astype(jnp.bfloat16), w_ref[0],
                preferred_element_type=jnp.float32)
    h = jnp.maximum(h + b_ref[0], 0.0)

    # Next-layer activations stay in VMEM (bf16); output tile written every
    # iteration -- only the last layer's writes survive in HBM.
    z_nxt[pl.ds(row0, tm), :] = h.astype(jnp.bfloat16)
    o_ref[...] = h.astype(o_ref.dtype)

    # End of layer: publish z_nxt as the input of the next layer.
    @pl.when(i == num_i - 1)
    def _():
        z_cur[...] = z_nxt[...]


def gconv_stack_pallas(a_pad, x_pad, w_stack, b_stack, *, tm):
    """Runs the full padded GCN layer stack in a single pallas_call."""
    n_pad = a_pad.shape[0]
    num_layers, fp, _ = w_stack.shape
    num_i = n_pad // tm

    # VMEM budget estimate (double-buffered inputs/outputs + resident scratch).
    est = 2 * (n_pad * n_pad * 2          # A_hat (bf16)
               + n_pad * fp * 2           # X (bf16)
               + fp * fp * 2              # W slab (bf16)
               + fp * 4                   # bias slab (f32)
               + tm * fp * 4)             # output tile (f32)
    est += 2 * (n_pad * fp * 2)           # z_cur / z_nxt scratch (bf16)
    vmem_limit = int(min(max(2 * est, 32 * 1024 * 1024), 48 * 1024 * 1024))

    kernel = functools.partial(_gconv_stack_kernel, tm=tm)
    return pl.pallas_call(
        kernel,
        out_shape=jax.ShapeDtypeStruct((n_pad, fp), jnp.float32),
        grid=(num_layers, num_i),
        in_specs=[
            # A_hat: full-array block, constant index map -> DMA'd once, resident.
            pl.BlockSpec((n_pad, n_pad), lambda l, i: (0, 0)),
            # X: full-array block, resident (only read at l == 0).
            pl.BlockSpec((n_pad, fp), lambda l, i: (0, 0)),
            # Per-layer weight / bias slabs, re-fetched only when `l` changes.
            pl.BlockSpec((1, fp, fp), lambda l, i: (l, 0, 0)),
            pl.BlockSpec((1, 1, fp), lambda l, i: (l, 0, 0)),
        ],
        out_specs=pl.BlockSpec((tm, fp), lambda l, i: (i, 0)),
        scratch_shapes=[
            pltpu.VMEM((n_pad, fp), jnp.bfloat16),   # z_cur (current activations)
            pltpu.VMEM((n_pad, fp), jnp.bfloat16),   # z_nxt (next-layer activations)
        ],
        compiler_params=pltpu.CompilerParams(
            # Layer axis is sequential; row axis also "arbitrary" because the
            # cross-layer dependency flows through per-core VMEM scratch.
            dimension_semantics=("arbitrary", "arbitrary"),
            vmem_limit_bytes=vmem_limit,
        ),
    )(a_pad, x_pad, w_stack, b_stack)


# ----------------------------------------------------------------------------
# Glue: GCN-normalized dense adjacency (matches PyG GCNConv gcn_norm semantics)
# ----------------------------------------------------------------------------
def gcn_norm_dense(edge_index, edge_weight, num_nodes):
    row, col = edge_index[0], edge_index[1]          # row = source, col = target
    if edge_weight is None:
        edge_weight = jnp.ones(row.shape[0], dtype=jnp.float32)
    a = jnp.zeros((num_nodes, num_nodes), jnp.float32)
    a = a.at[col, row].add(edge_weight.astype(jnp.float32))   # A[dst, src] += w
    # add_remaining_self_loops: keep existing self-loop weight, add 1.0 if absent.
    diag = jnp.diagonal(a)
    a = a + jnp.diag(jnp.where(diag == 0.0, 1.0, 0.0))
    deg = a.sum(axis=1)                               # in-degree at target nodes
    dinv = jnp.where(deg > 0.0, 1.0 / jnp.sqrt(deg), 0.0)
    return a * dinv[:, None] * dinv[None, :]


# ----------------------------------------------------------------------------
# GConv: parameters + forward
# ----------------------------------------------------------------------------
def init_gconv_params(key, input_dim, hidden_dim, num_layers):
    """Deterministic glorot-uniform weights, zero bias (GCNConv defaults)."""
    params = []
    dims = [input_dim] + [hidden_dim] * num_layers
    for li in range(num_layers):
        key, sub = jax.random.split(key)
        fan_in, fan_out = dims[li], dims[li + 1]
        limit = jnp.sqrt(6.0 / (fan_in + fan_out))
        w = jax.random.uniform(sub, (fan_in, fan_out), jnp.float32,
                               minval=-limit, maxval=limit)
        b = jnp.zeros((1, fan_out), jnp.float32)
        params.append((w, b))
    return params


def gconv_forward(params, x, edge_index, edge_weight=None):
    n, f_in = x.shape
    hidden = params[0][0].shape[1]
    num_layers = len(params)

    # Padding: features -> multiple of 128 (lane-dense), rows -> multiple of tm.
    fp = _round_up(max(f_in, hidden), 128)
    tm = 128 if n >= 128 else _round_up(n, 8)
    n_pad = _round_up(n, tm)

    a_hat = gcn_norm_dense(edge_index, edge_weight, n)            # (n, n) f32
    a_pad = jnp.zeros((n_pad, n_pad), jnp.bfloat16)
    a_pad = a_pad.at[:n, :n].set(a_hat.astype(jnp.bfloat16))
    x_pad = jnp.zeros((n_pad, fp), jnp.bfloat16)
    x_pad = x_pad.at[:n, :f_in].set(x.astype(jnp.bfloat16))

    w_stack = jnp.zeros((num_layers, fp, fp), jnp.bfloat16)
    b_stack = jnp.zeros((num_layers, 1, fp), jnp.float32)
    for li, (w, b) in enumerate(params):
        fi, fo = w.shape
        w_stack = w_stack.at[li, :fi, :fo].set(w.astype(jnp.bfloat16))
        b_stack = b_stack.at[li, :, :fo].set(b.astype(jnp.float32))

    out_pad = gconv_stack_pallas(a_pad, x_pad, w_stack, b_stack, tm=tm)
    return out_pad[:n, :hidden]


def gconv_reference(params, x, edge_index, edge_weight=None):
    """Plain-JAX f32 reference matching the PyTorch module semantics."""
    n = x.shape[0]
    a_hat = gcn_norm_dense(edge_index, edge_weight, n)
    z = x.astype(jnp.float32)
    for w, b in params:
        z = jnp.maximum(a_hat @ (z @ w) + b, 0.0)
    return z


# ----------------------------------------------------------------------------
if __name__ == "__main__":
    key = jax.random.PRNGKey(0)

    num_nodes = 16
    input_dim = 8
    hidden_dim = 32
    num_layers = 2
    num_edges = 32

    k_x, k_src, k_dst, k_w, k_params = jax.random.split(key, 5)
    x = jax.random.normal(k_x, (num_nodes, input_dim), jnp.float32)
    src = jax.random.randint(k_src, (num_edges,), 0, num_nodes, jnp.int32)
    dst = jax.random.randint(k_dst, (num_edges,), 0, num_nodes, jnp.int32)
    edge_index = jnp.stack([src, dst], axis=0)          # [2, E]
    edge_weight = jax.random.uniform(k_w, (num_edges,), jnp.float32, 0.5, 1.5)

    params = init_gconv_params(k_params, input_dim, hidden_dim, num_layers)

    out = jax.jit(gconv_forward)(params, x, edge_index, edge_weight)
    out = jax.block_until_ready(out)

    assert out.shape == (num_nodes, hidden_dim)
    assert bool(jnp.all(jnp.isfinite(out)))

    ref = gconv_reference(params, x, edge_index, edge_weight)
    assert bool(jnp.allclose(out, ref, rtol=5e-2, atol=5e-2)), (
        float(jnp.max(jnp.abs(out - ref))))

    print("KERNEL_OK")
</pallas_src>

<mosaic_0001>
module attributes {stable_mosaic.version = 11 : i64} {
  func.func private @main(%arg0: i32) attributes {dimension_semantics = [#tpu.dimension_semantics<core_parallel>], iteration_bounds = array<i64: 2>, tpu.core_type = #tpu.core_type<sc_scalar_subcore>, window_params = []} {
    return
  }
}

module attributes {stable_mosaic.version = 11 : i64} {
  func.func private @main(%arg0: i32) attributes {dimension_semantics = [#tpu.dimension_semantics<core_parallel>], iteration_bounds = array<i64: 2>, tpu.core_type = #tpu.core_type<sc_scalar_subcore>, window_params = []} {
    return
  }
}

module attributes {stable_mosaic.version = 11 : i64} {
  func.func @_gconv_stack_kernel(%arg0: i32, %arg1: i32, %arg2: memref<16x16xbf16, #tpu.memory_space<vmem>>, %arg3: memref<16x128xbf16, #tpu.memory_space<vmem>>, %arg4: memref<1x128x128xbf16, #tpu.memory_space<vmem>>, %arg5: memref<1x1x128xf32, #tpu.memory_space<vmem>>, %arg6: memref<16x128xf32, #tpu.memory_space<vmem>>, %arg7: memref<16x128xbf16, #tpu.memory_space<vmem>>, %arg8: memref<16x128xbf16, #tpu.memory_space<vmem>>) attributes {dimension_semantics = [#tpu.dimension_semantics<arbitrary>, #tpu.dimension_semantics<arbitrary>], iteration_bounds = array<i64: 2, 1>, scalar_prefetch = 0 : i64, scratch_operands = 2 : i64, tpu.core_type = #tpu.core_type<tc>, window_params = [{pipeline_mode = #tpu.pipeline_mode<synchronous>, transform_indices = @transform_0, window_bounds = array<i64: 16, 16>}, {pipeline_mode = #tpu.pipeline_mode<synchronous>, transform_indices = @transform_1, window_bounds = array<i64: 16, 128>}, {transform_indices = @transform_2, window_bounds = array<i64: 1, 128, 128>}, {transform_indices = @transform_3, window_bounds = array<i64: 1, 1, 128>}, {transform_indices = @transform_4, window_bounds = array<i64: 16, 128>}]} {
    %c0_i32 = arith.constant 0 : i32
    %0 = arith.cmpi eq, %arg0, %c0_i32 : i32
    %c0_i32_0 = arith.constant 0 : i32
    %1 = arith.cmpi eq, %arg1, %c0_i32_0 : i32
    %2 = arith.andi %0, %1 : i1
    %3 = arith.extui %2 : i1 to i32
    %c0_i32_1 = arith.constant 0 : i32
    %4 = arith.cmpi ne, %3, %c0_i32_1 : i32
    scf.if %4 {
      %c0_17 = arith.constant 0 : index
      %c0_18 = arith.constant 0 : index
      %28 = vector.load %arg3[%c0_17, %c0_18] : memref<16x128xbf16, #tpu.memory_space<vmem>>, vector<16x128xbf16>
      %c0_19 = arith.constant 0 : index
      %c0_20 = arith.constant 0 : index
      %29 = vector.load %arg7[%c0_19, %c0_20] : memref<16x128xbf16, #tpu.memory_space<vmem>>, vector<16x128xbf16>
      tpu.vector_store %arg7[%c0_19, %c0_20], %28 {strides = array<i32>} : memref<16x128xbf16, #tpu.memory_space<vmem>>, vector<16x128xbf16>,
    } else {
    }
    %c16_i32 = arith.constant 16 : i32
    %5 = arith.muli %arg1, %c16_i32 : i32
    %6 = tpu.assume_multiple %5, 16 : i32
    %7 = arith.index_cast %6 : i32 to index
    %c0 = arith.constant 0 : index
    %8 = vector.load %arg2[%7, %c0] : memref<16x16xbf16, #tpu.memory_space<vmem>>, vector<16x16xbf16>
    %c0_2 = arith.constant 0 : index
    %c0_3 = arith.constant 0 : index
    %9 = vector.load %arg7[%c0_2, %c0_3] : memref<16x128xbf16, #tpu.memory_space<vmem>>, vector<16x128xbf16>
    %cst = arith.constant dense<0.000000e+00> : vector<16x128xf32>
    %10 = tpu.matmul %8, %9, %cst {dimension_numbers = #tpu.dot_dimension_numbers<[1], [0], [0], [1], [0, 0, 1, 1], [], []>} : vector<16x16xbf16>, vector<16x128xbf16>, vector<16x128xf32> -> vector<16x128xf32>
    %11 = arith.truncf %10 : vector<16x128xf32> to vector<16x128xbf16>
    %c0_4 = arith.constant 0 : index
    %c0_5 = arith.constant 0 : index
    %c0_6 = arith.constant 0 : index
    %12 = vector.load %arg4[%c0_4, %c0_5, %c0_6] : memref<1x128x128xbf16, #tpu.memory_space<vmem>>, vector<1x128x128xbf16>
    %13 = vector.shape_cast %12 : vector<1x128x128xbf16> to vector<128x128xbf16>
    %cst_7 = arith.constant dense<0.000000e+00> : vector<16x128xf32>
    %14 = tpu.matmul %11, %13, %cst_7 {dimension_numbers = #tpu.dot_dimension_numbers<[1], [0], [0], [1], [0, 0, 1, 1], [], []>} : vector<16x128xbf16>, vector<128x128xbf16>, vector<16x128xf32> -> vector<16x128xf32>
    %c0_8 = arith.constant 0 : index
    %c0_9 = arith.constant 0 : index
    %c0_10 = arith.constant 0 : index
    %15 = vector.load %arg5[%c0_8, %c0_9, %c0_10] : memref<1x1x128xf32, #tpu.memory_space<vmem>>, vector<1x1x128xf32>
    %16 = vector.shape_cast %15 : vector<1x1x128xf32> to vector<1x128xf32>
    %17 = vector.broadcast %16 : vector<1x128xf32> to vector<16x128xf32>
    %18 = arith.addf %14, %17 : vector<16x128xf32>
    %cst_11 = arith.constant 0.000000e+00 : f32
    %19 = vector.broadcast %cst_11 : f32 to vector<16x128xf32>
    %20 = arith.maximumf %18, %19 : vector<16x128xf32>
    %21 = arith.truncf %20 : vector<16x128xf32> to vector<16x128xbf16>
    %22 = arith.index_cast %6 : i32 to index
    %c0_12 = arith.constant 0 : index
    %23 = vector.load %arg8[%22, %c0_12] : memref<16x128xbf16, #tpu.memory_space<vmem>>, vector<16x128xbf16>
    tpu.vector_store %arg8[%22, %c0_12], %21 {strides = array<i32>} : memref<16x128xbf16, #tpu.memory_space<vmem>>, vector<16x128xbf16>,
    %c0_13 = arith.constant 0 : index
    %c0_14 = arith.constant 0 : index
    %24 = vector.load %arg6[%c0_13, %c0_14] : memref<16x128xf32, #tpu.memory_space<vmem>>, vector<16x128xf32>
    tpu.vector_store %arg6[%c0_13, %c0_14], %20 {strides = array<i32>} : memref<16x128xf32, #tpu.memory_space<vmem>>, vector<16x128xf32>,
    %c0_i32_15 = arith.constant 0 : i32
    %25 = arith.cmpi eq, %arg1, %c0_i32_15 : i32
    %26 = arith.extui %25 : i1 to i32
    %c0_i32_16 = arith.constant 0 : i32
    %27 = arith.cmpi ne, %26, %c0_i32_16 : i32
    scf.if %27 {
      %c0_17 = arith.constant 0 : index
      %c0_18 = arith.constant 0 : index
      %28 = vector.load %arg8[%c0_17, %c0_18] : memref<16x128xbf16, #tpu.memory_space<vmem>>, vector<16x128xbf16>
      %c0_19 = arith.constant 0 : index
      %c0_20 = arith.constant 0 : index
      %29 = vector.load %arg7[%c0_19, %c0_20] : memref<16x128xbf16, #tpu.memory_space<vmem>>, vector<16x128xbf16>
      tpu.vector_store %arg7[%c0_19, %c0_20], %28 {strides = array<i32>} : memref<16x128xbf16, #tpu.memory_space<vmem>>, vector<16x128xbf16>,
    } else {
    }
    return
  }
  func.func @transform_0(%arg0: i32, %arg1: i32) -> (i32, i32) {
    %c0_i32 = arith.constant 0 : i32
    %c0_i32_0 = arith.constant 0 : i32
    %c0_i32_1 = arith.constant 0 : i32
    return %c0_i32, %c0_i32_0 : i32, i32
  }
  func.func @transform_1(%arg0: i32, %arg1: i32) -> (i32, i32) {
    %c0_i32 = arith.constant 0 : i32
    %c0_i32_0 = arith.constant 0 : i32
    %c0_i32_1 = arith.constant 0 : i32
    return %c0_i32, %c0_i32_0 : i32, i32
  }
  func.func @transform_2(%arg0: i32, %arg1: i32) -> (i32, i32, i32) {
    %c0_i32 = arith.constant 0 : i32
    %c0_i32_0 = arith.constant 0 : i32
    %c0_i32_1 = arith.constant 0 : i32
    return %arg0, %c0_i32, %c0_i32_0 : i32, i32, i32
  }
  func.func @transform_3(%arg0: i32, %arg1: i32) -> (i32, i32, i32) {
    %c0_i32 = arith.constant 0 : i32
    %c0_i32_0 = arith.constant 0 : i32
    %c0_i32_1 = arith.constant 0 : i32
    return %arg0, %c0_i32, %c0_i32_0 : i32, i32, i32
  }
  func.func @transform_4(%arg0: i32, %arg1: i32) -> (i32, i32) {
    %c0_i32 = arith.constant 0 : i32
    %c0_i32_0 = arith.constant 0 : i32
    return %arg1, %c0_i32 : i32, i32
  }
}

</mosaic_0001>

<bundles_post_ra>
// kernel: gconv_forward.1
= control target key start
LH: loop header
LB: loop body
LE: loop exit
PB: predicated region body
PF: predicated region fallthrough
CT: control target
= control target key end

     0   :  { %9 = vsyncpa [#allocation5], 0  ;;  %s701_s15 = smov 0   ;;  %s703_s16 = smov 0   ;;  %s777_s0 = inlined_call_operand.vmem [shape: bf16[16,16], index: 0, kind: input, shape index: {}]   ;;  %s778_s1 = inlined_call_operand.vmem [shape: bf16[16,128], index: 1, kind: input, shape index: {}]   ;;  %s779_s2 = inlined_call_operand.vmem [shape: bf16[2,128,128], index: 2, kind: input, shape index: {}]   ;;  %s780_s3 = inlined_call_operand.vmem [shape: f32[2,1,128], index: 3, kind: input, shape index: {}]   ;;  %s781_s4 = inlined_call_operand.hbm [shape: f32[16,128], index: 4, kind: output, shape index: {}]  }
   0x1   :  { %s705_s17 = smov 0  }
   0x2 LB: > { %s503_s18 = sadd.s32 4294967295, %s669_s17   ;;  %s27_s19 = sadd.s32 1, %s665_s16  ;;  %s669_s17 = sphi %s705_s17, %s15_s17   ;;  %s665_s16 = sphi %s703_s16, %s784_s16   ;;  %s661_s15 = sphi %s701_s15, %s783_s15  }
   0x3   : > { %p29_p0 = scmp.ge.s32.totalorder %s27_s19, 2  ;;  %p506_p1 = scmp.ge.s32.totalorder %s669_s17, 1 }
   0x4   : > { %p183_p2 = scmp.lt.s32.totalorder %s669_s17, 3 }
   0x5   : > { %s786_s19 = smov (%p29_p0, %s27_s19), 0 }
   0x6   : > { %p184_p3 = pnand %p506_p1, %p183_p2 }
   0x7   : > { %p207_p4 = scmp.lt.s32.totalorder (!%p184_p3), %s661_s15, 1  ;;  %p217_p5 = scmp.eq.s32.totalorder (!%p184_p3), %s661_s15, 0 }
   0x8   : > { %187 = sbr.rel (%p184_p3) target bundleno = 438 (0x1b6), region = 36 }
   0xd   : > { %s788_s15 = smov (!%p207_p4, %s661_s15), 1  ;;  %222 = sbr.rel (!%p217_p5) target bundleno = 18 (0x12), region = 40  ;;  %v223_v0 = vld [vmem:[%s778_s1] sm:$0xff] (%p217_p5)  }
   0xe   : > { %s528_s20 = sshll.u32 %s788_s15, 6  ;;  %s214_s23 = scalar_lea.vmem %s780_s3, %s788_s15  ;;  %225 = vst [vmem:[#allocation2] sm:$0xff] (%p217_p5), %v223_v0  }
   0xf   : > { %s730_s26 = scalar_lea.vmem %s779_s2, %s528_s20 }
  0x12 PF: > { %v671_v2 = vmov 0.0   ;;  %v610_v3 = vld [vmem:[%s777_s0] sm:$0xff]   ;;  %vm672_vm0 = vmmov 0   ;;  %vm247_vm1 = vcmask 130048   ;;  %v611_v4 = vld [vmem:[%s730_s26 + $0x38] sm:$0xff]   ;;  %v612_v5 = vld [vmem:[%s730_s26 + $0x30] sm:$0xff]  }
  0x13   : > { %548 = vmatprep.subr.bf16.mxu0 %v671_v2  ;;  %554 = vmatprep.subr.bf16.mxu1 %v671_v2  ;;  %v613_v6 = vld [vmem:[%s730_s26 + $0x28] sm:$0xff]   ;;  %v614_v7 = vld [vmem:[%s730_s26 + $0x20] sm:$0xff]   ;;  %v615_v8 = vld [vmem:[%s730_s26 + $0x18] sm:$0xff]   ;;  %s673_s7 = smov [#allocation4]   ;;  %p753_p6 = scmp.eq.s32.totalorder %s503_s18, 1 }
  0x14   : > { %550 = vmatprep.mubr.msk.bf16.mxu0 %vm672_vm0, %v671_v2  ;;  %570 = vmatprep.mubr.msk.bf16.mxu1 %vm672_vm0, %v671_v2  ;;  %v616_v9 = vld [vmem:[%s730_s26 + $0x10] sm:$0xff]   ;;  %v617_v10 = vld [vmem:[%s730_s26 + $0x8] sm:$0xff]   ;;  %v618_v11 = vld [vmem:[%s730_s26] sm:$0xff]   ;;  %s437_s8 = sshll.u32 %s673_s7, 4  ;;  %s438_s8 = int_to_ptr.vmem [resolvable:$true] %s437_s8 }
  0x15   : > { %v609_v1 = vld [vmem:[#allocation2] sm:$0xff]   ;;  %555 = vmatpush3.bf16.msra.mxu1 %v611_v4  ;;  %s619_s10 = scalar_lea.vmem %s438_s8, 256  ;;  %p626_p10 = scmp.lt.s32.totalorder %s438_s8, %s438_s8 }
  0x16   : > { %549 = vmatpush3.bf16.msra.mxu0 %v609_v1  ;;  %556 = vmatprep.subr.bf16.mxu1 %v671_v2  ;;  %v513_v17 = vld [vmem:[%s214_s23] ss:$0 sm:$0xff]  ;;  %p620_p7 = scmp.ne.s32.totalorder %s438_s8, %s619_s10  ;;  %p627_p11 = scmp.lt.s32.totalorder %s619_s10, %s619_s10 }
  0x18   : > { %p621_p8 = pnand %p620_p7, %p753_p6  ;;  %p628_p12 = por %p627_p11, %p626_p10 }
  0x19   : > { %551 = vmatmul.mubr.msk.bf16.vlgmr.msra.gmra.mxu0 %vm247_vm1, %v610_v3  ;;  %557 = vmatpush3.bf16.msra.mxu1 %v612_v5 }
  0x1a   : > { %558 = vmatprep.subr.bf16.mxu1 %v671_v2  ;;  %p622_p9 = pneg %p621_p8 }
  0x1c   : > { %p629_p13 = pnand %p628_p12, %p622_p9 }
  0x1d   : > { %559 = vmatpush3.bf16.msra.mxu1 %v613_v6 }
  0x1e   : > { %560 = vmatprep.subr.bf16.mxu1 %v671_v2 }
  0x21   : > { %561 = vmatpush3.bf16.msra.mxu1 %v614_v7 }
  0x22   : > { %562 = vmatprep.subr.bf16.mxu1 %v671_v2 }
  0x25   : > { %563 = vmatpush3.bf16.msra.mxu1 %v615_v8 }
  0x26   : > { %564 = vmatprep.subr.bf16.mxu1 %v671_v2 }
  0x29   : > { %565 = vmatpush3.bf16.msra.mxu1 %v616_v9 }
  0x2a   : > { %566 = vmatprep.subr.bf16.mxu1 %v671_v2 }
  0x2d   : > { %567 = vmatpush3.bf16.msra.mxu1 %v617_v10 }
  0x2e   : > { %568 = vmatprep.subr.bf16.mxu1 %v671_v2 }
  0x31   : > { %569 = vmatpush3.bf16.msra.mxu1 %v618_v11 }
  0xd9   : > { %v285_v12 = vpop.f32.mrf.mxu0 }
  0xdb   : > { %v552_v13 = vpop.f32.mrf.mxu0 }
  0xdd   : > { %v288_v14 = vpop.f32.mrf.mxu0 }
  0xde   : > { %v292_v15 = vpack.c.bf16 %v288_v14, %v285_v12 }
  0xdf   : > { %v553_v16 = vpop.f32.mrf.mxu0 }
  0xe0   : > { %571 = vmatmul.mubr.bf16.vlgmr.msra.gmra.mxu1 %v292_v15 }
 0x1a0   : > { %v398_v18 = vpop.f32.mrf.mxu1 }
 0x1a1   : > { %v399_v19 = vadd.f32 %v513_v17, %v398_v18 }
 0x1a2   : > { %v572_v20 = vpop.f32.mrf.mxu1 }
 0x1a3   : > { %v405_v21 = vmax.f32 %v399_v19, 0.0 }
 0x1a4   : > { %v401_v22 = vpop.f32.mrf.mxu1 }
 0x1a5   : > { %419 = vst [vmem:[#allocation4] sm:$0xff] %v405_v21  ;;  %v402_v23 = vadd.f32 %v513_v17, %v401_v22 }
 0x1a6   : > { %v573_v24 = vpop.f32.mrf.mxu1 }
 0x1a7   : > { %v406_v25 = vmax.f32 %v402_v23, 0.0 }
 0x1a9   : > { %v535_v26 = vpack.c.bf16 %v406_v25, %v405_v21  ;;  %420 = vst [vmem:[#allocation4 + $0x8] sm:$0xff] %v406_v25 }
 0x1aa   : > { %632 = shalt.err (!%p629_p13)
}
 0x1ab   : > { %s674_s11 = smov 128   ;;  %s675_s12 = smov 8   ;;  %536 = vst [vmem:[#allocation3] sm:$0xff] %v535_v26  }
 0x1ac   : > { %575 = dma.vmem_to_hbm [thread:$0]  (%p753_p6), %s438_s8, 256, %s781_s4, [#allocation5], %s674_s11, %s674_s11, %s675_s12  }
 0x1b2   : > { %v424_v27 = vld [vmem:[#allocation3] sm:$0xff]  }
 0x1b3   : > { %426 = vst [vmem:[#allocation2] sm:$0xff] %v424_v27  }
 0x1b4   : > { %656 = dma.done.wait (%p753_p6), [#allocation5], 256  }
 0x1b5   : > { %658 = vsyncadd (%p753_p6), [#allocation5], 4294967040 }
 0x1b6 PF: > { %s15_s17 = sadd.s32 1, %s669_s17   ;;  %s783_s15 = smov %s665_s16 }
 0x1b7   : > { %p12_p0 = scmp.ge.s32.totalorder %s15_s17, 4   ;;  %s784_s16 = smov %s786_s19 }
 0x1b9   :  { %14 = sbr.rel (!%p12_p0) target bundleno = 2 (0x2), region = 77 }
 0x1be   :  { %453 = vsyncpa [#allocation5], 1 }
 0x1bf   :  { %455 = vsyncpa [#allocation5 + $0x1], 1 }

</bundles_post_ra>
